<compile_context>
chip_gen: v5e
topology: v5e:2x2
jax: 0.10.0
libtpu: 0.0.40
codegen_flags: <defaults>
</compile_context>

<pallas_src>
import jax
import jax.numpy as jnp
from jax.experimental import pallas as pl
from jax.experimental.pallas import tpu as pltpu


def _round_up(x, m):
    return ((x + m - 1) // m) * m


def _cdiv(a, b):
    return (a + b - 1) // b


def _pick_tile_c(c_pad, cap=1024):
    """Largest multiple of 128 that divides c_pad and is <= cap."""
    if c_pad <= cap:
        return c_pad
    t = cap - (cap % 128)
    while t >= 128:
        if c_pad % t == 0:
            return t
        t -= 128
    return 128


def _choose_tile_n(n_rows, c_pad, tile_n):
    """Row tile: big (1024 target), multiple of 8, bounded by VMEM, >=2 grid steps."""
    n8 = _round_up(max(n_rows, 1), 8)
    if tile_n is None:
        tile_n = 1024
    # Keep the in-kernel (tile_n, c_pad) one-hot intermediate around <= 8 MiB.
    cap = max(8, (((8 << 20) // (c_pad * 4)) // 8) * 8)
    tile_n = max(8, min(_round_up(tile_n, 8), n8, cap))
    # v7x megacore: make sure the row axis has >= 2 grid steps when there is work.
    if _cdiv(n8, tile_n) < 2 and n8 >= 16:
        tile_n = max(8, _round_up(_cdiv(n8, 2), 8))
    return tile_n


def embednet_kernel(idx_ref, table_ref, out_ref):
    # idx_ref   : (tile_n, 1) int32     -- class index per output row
    # table_ref : (c_pad, tile_c) f32   -- column block of fused table M = emb @ W.T + b
    # out_ref   : (tile_n, tile_c) out_dtype
    idx = idx_ref[...]                                               # (tile_n, 1)
    tile_n = out_ref.shape[0]
    c_pad = table_ref.shape[0]

    # Exact row-select of the fused table as a one-hot matmul (weights are 0.0/1.0,
    # so the f32 result is bit-exact row copies of the table).
    iota = jax.lax.broadcasted_iota(jnp.int32, (tile_n, c_pad), 1)   # (tile_n, c_pad)
    onehot = (idx == iota).astype(jnp.float32)                       # (tile_n, c_pad)
    sel = jnp.dot(onehot, table_ref[...],
                  preferred_element_type=jnp.float32)                # (tile_n, tile_c)
    out_ref[...] = sel.astype(out_ref.dtype)


def embednet_forward(indices, emb_table, lin_w, lin_b, *,
                     tile_n=None, tile_c=None,
                     out_dtype=jnp.float32, return_padded=False):
    """indices: (B, S) int; emb_table: (C, E); lin_w: (C, E); lin_b: (C,)."""
    B, S = indices.shape
    C, E = emb_table.shape
    N = B * S

    # Fuse embedding + linear once, outside the kernel:
    #   M[i, j] = emb[i] . W[j] + b[j]   (output row for index i is just M[i]).
    fused = (emb_table.astype(jnp.float32) @ lin_w.astype(jnp.float32).T
             + lin_b.astype(jnp.float32)[None, :])                   # (C, C)

    # Pad the class dim to a multiple of 128 (lane-dense stores, full MXU lanes).
    c_pad = _round_up(C, 128)
    fused_p = jnp.zeros((c_pad, c_pad), jnp.float32).at[:C, :C].set(fused)

    # --- class (column) tiling: keeps the resident table block VMEM-bounded ---
    if tile_c is None:
        tile_c = _pick_tile_c(c_pad)
    tile_c = min(_round_up(tile_c, 128), c_pad)
    if c_pad % tile_c != 0:
        tile_c = _pick_tile_c(c_pad)
    n_col = c_pad // tile_c

    # --- row tiling ---
    tile_n = _choose_tile_n(N, c_pad, tile_n)
    n_pad = _round_up(N, tile_n)
    n_row = n_pad // tile_n

    # PyTorch nn.Embedding would raise on out-of-range indices; clamp defensively
    # so padded / invalid rows select row 0 instead of producing garbage.
    idx_flat = jnp.clip(indices.reshape(-1).astype(jnp.int32), 0, C - 1)
    idx_flat = jnp.zeros((n_pad,), jnp.int32).at[:N].set(idx_flat).reshape(n_pad, 1)

    out_itemsize = jnp.dtype(out_dtype).itemsize

    # VMEM budget: table block (x2 buffers), output block (x2), index block (x2,
    # lane-padded), plus the in-kernel one-hot intermediate.  Raise the scoped
    # VMEM limit only when the default (16 MiB v5e / 32 MiB v6e,v7x) is at risk.
    vmem_needed = (2 * c_pad * tile_c * 4
                   + 2 * tile_n * tile_c * out_itemsize
                   + 2 * tile_n * 128 * 4
                   + tile_n * c_pad * 4)
    vmem_limit = None
    if vmem_needed > 24 * 1024 * 1024:
        vmem_limit = min(int(vmem_needed * 1.5) + (4 << 20), 100 * 1024 * 1024)

    cost = pl.CostEstimate(
        flops=2 * n_pad * c_pad * c_pad,
        transcendentals=0,
        bytes_accessed=n_pad * 4 + c_pad * c_pad * 4 + n_pad * c_pad * out_itemsize,
    )

    out = pl.pallas_call(
        embednet_kernel,
        out_shape=jax.ShapeDtypeStruct((n_pad, c_pad), out_dtype),
        # Column axis outermost: the table block index is constant across all
        # inner row steps, so Pallas only DMAs each table column block once.
        grid=(n_col, n_row),
        in_specs=[
            pl.BlockSpec((tile_n, 1), lambda j, i: (i, 0)),       # per-tile indices
            pl.BlockSpec((c_pad, tile_c), lambda j, i: (0, j)),   # fused table column block
        ],
        out_specs=pl.BlockSpec((tile_n, tile_c), lambda j, i: (i, j)),
        compiler_params=pltpu.CompilerParams(
            dimension_semantics=("parallel", "parallel"),         # v7x: 2 TCs split work
            vmem_limit_bytes=vmem_limit),
        cost_estimate=cost,
    )(idx_flat, fused_p)

    if return_padded:
        # Zero-copy path for consumers that accept the (n_pad, c_pad) layout.
        return out
    # When C % 128 == 0 and N % tile_n == 0 this slice is a no-op reshape.
    return out[:N, :C].reshape(B, S, C)


if __name__ == "__main__":
    nclasses = 48     # TIMIT-tri style class count (small synthetic choice)
    emb_dim = 20      # fixed by the module
    B, S = 2, 8       # small batch / sequence of indices

    key = jax.random.PRNGKey(0)
    k_idx, k_emb, k_w, k_b = jax.random.split(key, 4)

    # Deterministic synthetic parameters (PyTorch-like init).
    emb_table = jax.random.normal(k_emb, (nclasses, emb_dim), dtype=jnp.float32)
    bound = 1.0 / (emb_dim ** 0.5)
    lin_w = jax.random.uniform(k_w, (nclasses, emb_dim), dtype=jnp.float32,
                               minval=-bound, maxval=bound)
    lin_b = jax.random.uniform(k_b, (nclasses,), dtype=jnp.float32,
                               minval=-bound, maxval=bound)

    # Integer index input, as nn.Embedding expects.
    indices = jax.random.randint(k_idx, (B, S), 0, nclasses, dtype=jnp.int32)

    out = embednet_forward(indices, emb_table, lin_w, lin_b)
    out = jax.block_until_ready(out)

    # Pure-JAX reference of the same forward pass.
    ref = emb_table[indices] @ lin_w.T + lin_b
    assert out.shape == (B, S, nclasses)
    assert jnp.allclose(out, ref, atol=1e-5, rtol=1e-5)

    print("KERNEL_OK")
</pallas_src>

<mosaic_0001>
module attributes {stable_mosaic.version = 11 : i64} {
  func.func @embednet_kernel(%arg0: i32, %arg1: i32, %arg2: memref<8x1xi32, #tpu.memory_space<vmem>>, %arg3: memref<128x128xf32, #tpu.memory_space<vmem>>, %arg4: memref<8x128xf32, #tpu.memory_space<vmem>>) attributes {dimension_semantics = [#tpu.dimension_semantics<parallel>, #tpu.dimension_semantics<parallel>], iteration_bounds = array<i64: 1, 2>, scalar_prefetch = 0 : i64, scratch_operands = 0 : i64, tpu.core_type = #tpu.core_type<tc>, window_params = [{transform_indices = @transform_0, window_bounds = array<i64: 8, 1>}, {transform_indices = @transform_1, window_bounds = array<i64: 128, 128>}, {transform_indices = @transform_2, window_bounds = array<i64: 8, 128>}]} {
    %c0 = arith.constant 0 : index
    %c0_0 = arith.constant 0 : index
    %0 = vector.load %arg2[%c0, %c0_0] : memref<8x1xi32, #tpu.memory_space<vmem>>, vector<8x1xi32>
    %1 = tpu.iota {dimensions = array<i32: 1>} : vector<8x128xi32>
    %2 = vector.broadcast %0 : vector<8x1xi32> to vector<8x128xi32>
    %3 = arith.cmpi eq, %2, %1 : vector<8x128xi32>
    %4 = arith.extui %3 : vector<8x128xi1> to vector<8x128xi32>
    %5 = arith.sitofp %4 : vector<8x128xi32> to vector<8x128xf32>
    %c0_1 = arith.constant 0 : index
    %c0_2 = arith.constant 0 : index
    %6 = vector.load %arg3[%c0_1, %c0_2] : memref<128x128xf32, #tpu.memory_space<vmem>>, vector<128x128xf32>
    %cst = arith.constant dense<0.000000e+00> : vector<8x128xf32>
    %7 = tpu.matmul %5, %6, %cst {dimension_numbers = #tpu.dot_dimension_numbers<[1], [0], [0], [1], [0, 0, 1, 1], [], []>} : vector<8x128xf32>, vector<128x128xf32>, vector<8x128xf32> -> vector<8x128xf32>
    %c0_3 = arith.constant 0 : index
    %c0_4 = arith.constant 0 : index
    %8 = vector.load %arg4[%c0_3, %c0_4] : memref<8x128xf32, #tpu.memory_space<vmem>>, vector<8x128xf32>
    tpu.vector_store %arg4[%c0_3, %c0_4], %7 {strides = array<i32>} : memref<8x128xf32, #tpu.memory_space<vmem>>, vector<8x128xf32>,
    return
  }
  func.func @transform_0(%arg0: i32, %arg1: i32) -> (i32, i32) {
    %c0_i32 = arith.constant 0 : i32
    %c0_i32_0 = arith.constant 0 : i32
    return %arg1, %c0_i32 : i32, i32
  }
  func.func @transform_1(%arg0: i32, %arg1: i32) -> (i32, i32) {
    %c0_i32 = arith.constant 0 : i32
    %c0_i32_0 = arith.constant 0 : i32
    return %c0_i32, %arg0 : i32, i32
  }
  func.func @transform_2(%arg0: i32, %arg1: i32) -> (i32, i32) {
    %c0_i32 = arith.constant 0 : i32
    return %arg1, %arg0 : i32, i32
  }
}

</mosaic_0001>

<bundles_post_ra>
// kernel: tpu_custom_call.1
= control target key start
LH: loop header
LB: loop body
LE: loop exit
PB: predicated region body
PF: predicated region fallthrough
CT: control target
= control target key end

     0   :  { %7 = vsyncpa [#allocation3], 0  ;;  %s642_s0 = inlined_call_operand.vmem [shape: s32[16,1], index: 0, kind: input, shape index: {}]   ;;  %s643_s1 = inlined_call_operand.hbm [shape: f32[128,128], index: 1, kind: input, shape index: {}]   ;;  %s644_s2 = inlined_call_operand.hbm [shape: f32[16,128], index: 2, kind: output, shape index: {}]  }
   0x1   :  { %8 = vsyncpa [#allocation4], 0 }
   0x2   :  { %10 = vsyncpa [#allocation4 + $0x1], 0  ;;  %s542_s9 = smov 0   ;;  %s544_s10 = smov 0  }
   0x3   :  { %s546_s11 = smov 0   ;;  %s548_s12 = smov 0  }
   0x4   :  { %s550_s13 = smov 0   ;;  %s552_s14 = smov 0  }
   0x5 LB: > { %s322_s15 = sadd.s32 4294967295, %s520_s14   ;;  %s323_s16 = sadd.s32 4294967294, %s520_s14   ;;  %s520_s14 = sphi %s552_s14, %s16_s14   ;;  %s516_s13 = sphi %s550_s13, %s651_s13   ;;  %s512_s12 = sphi %s548_s12, %s650_s12   ;;  %s508_s11 = sphi %s546_s11, %s649_s11   ;;  %s504_s10 = sphi %s544_s10, %s648_s10   ;;  %s500_s9 = sphi %s542_s9, %s647_s9  }
   0x6   : > { %s25_s17 = sadd.s32 1, %s516_s13  ;;  %s89_s18 = sadd.s32 1, %s508_s11 }
   0x7   : > { %p26_p0 = scmp.ge.s32.totalorder %s25_s17, 2  ;;  %p99_p1 = scmp.ne.s32.totalorder %s508_s11, %s504_s10 }
   0x8   : > { %p100_p2 = scmp.eq.s32.totalorder %s322_s15, 1  ;;  %p105_p3 = scmp.ne.s32.totalorder %s504_s10, %s500_s9 }
   0x9   : > { %s653_s17 = smov (%p26_p0, %s25_s17), 0  ;;  %p106_p5 = scmp.eq.s32.totalorder %s323_s16, 1 }
   0xa   : > { %p582_p4 = por %p100_p2, %p99_p1  ;;  %s84_s20 = ssub.s32 %s516_s13, %s653_s17 }
   0xb   : > { %p324_p6 = scmp.ge.s32.totalorder %s520_s14, 1  ;;  %p87_p7 = scmp.eq.s32.totalorder %s84_s20, 0 }
   0xc   : > { %p589_p8 = por %p106_p5, %p105_p3  ;;  %p113_p9 = scmp.lt.s32.totalorder %s520_s14, 3 }
   0xd   : > { %s595_s22 = scalar_select %p87_p7, %s508_s11, %s89_s18  }
   0xe   : > { %p114_p10 = pnand %p324_p6, %p113_p9  ;;  %p351_p11 = scmp.eq.s32.totalorder %s322_s15, 0 }
   0xf   : > { %s126_s25 = sshll.u32 %s643_s1, 4  ;;  %s522_s26 = smov [#allocation2]   ;;  %s127_s25 = int_to_ptr.hbm [resolvable:$true] %s126_s25 }
  0x10   : > { %p343_p12 = pneg %p114_p10  ;;  %s128_s27 = sshll.u32 %s522_s26, 4  ;;  %s129_s27 = int_to_ptr.vmem [resolvable:$true] %s128_s27 }
  0x11   : > { %s523_s28 = smov 128   ;;  %s524_s29 = smov 8  }
  0x12   : > { %p344_p13 = pnand %p351_p11, %p343_p12  ;;  %151 = sbr.rel (%p114_p10) target bundleno = 276 (0x114), region = 28 }
  0x14   : > { %346 = dma.hbm_to_vmem [thread:$0]  (!%p344_p13), %s127_s25, 2048, %s129_s27, [#allocation3], %s523_s28, %s523_s28, %s524_s29  }
  0x17   : > { %491 = dma.done.wait (%p351_p11), [#allocation3], 2048  }
  0x18   : > { %493 = vsyncadd (%p351_p11), [#allocation3], 4294965248  ;;  %p173_p0 = scmp.lt.s32.totalorder %s512_s12, 1  ;;  %v525_v0 = vmov 0   ;;  %v201_v2 = vld [vmem:[#allocation2 + $0x78] sm:$0xff]  ;;  %v200_v3 = vld [vmem:[#allocation2 + $0x70] sm:$0xff]  ;;  %v178_v18 = vlaneseq }
  0x19   : > { %407 = vset.pattern.permute.xlu0 %v525_v0  ;;  %202 = vmatpush.msra.mxu0 %v201_v2  ;;  %v199_v4 = vld [vmem:[#allocation2 + $0x68] sm:$0xff]  ;;  %v198_v5 = vld [vmem:[#allocation2 + $0x60] sm:$0xff]  ;;  %v197_v6 = vld [vmem:[#allocation2 + $0x58] sm:$0xff]  ;;  %v526_v21 = vmov 1.0   ;;  %s170_s7 = sand.u32 1, %s504_s10   ;;  %s334_s15 = sshll.u32 %s512_s12, 3 }
  0x1a   : > { %s174_s30 = scalar_select %p173_p0, %s512_s12, 1  ;;  %v196_v7 = vld [vmem:[#allocation2 + $0x50] sm:$0xff]  ;;  %v195_v8 = vld [vmem:[#allocation2 + $0x48] sm:$0xff]  ;;  %v194_v9 = vld [vmem:[#allocation2 + $0x40] sm:$0xff]  ;;  %v179_v19 = vand.u32 127, %v178_v18 }
  0x1b   : > { %203 = vmatpush.msra.mxu0 %v200_v3  ;;  %v193_v10 = vld [vmem:[#allocation2 + $0x38] sm:$0xff]  ;;  %v192_v11 = vld [vmem:[#allocation2 + $0x30] sm:$0xff]  ;;  %v191_v12 = vld [vmem:[#allocation2 + $0x28] sm:$0xff]  ;;  %s329_s8 = sshll.u32 %s170_s7, 3  ;;  %s235_s20 = scalar_lea.hbm %s644_s2, %s334_s15 }
  0x1c   : > { %s330_s3 = sshll.u32 %s174_s30, 3  ;;  %v190_v13 = vld [vmem:[#allocation2 + $0x20] sm:$0xff]  ;;  %v189_v14 = vld [vmem:[#allocation2 + $0x18] sm:$0xff]  ;;  %v188_v15 = vld [vmem:[#allocation2 + $0x10] sm:$0xff]  ;;  %s172_s23 = scalar_lea.vmem [#allocation5], %s329_s8 }
  0x1d   : > { %s176_s6 = scalar_lea.vmem %s642_s0, %s330_s3  ;;  %204 = vmatpush.msra.mxu0 %v199_v4  ;;  %v187_v16 = vld [vmem:[#allocation2 + $0x8] sm:$0xff]  ;;  %v186_v17 = vld [vmem:[#allocation2] sm:$0xff]  ;;  %s237_s24 = sshll.u32 %s172_s23, 4  ;;  %s238_s24 = int_to_ptr.vmem [resolvable:$true] %s237_s24 }
  0x1e   : > { %v177_v1 = vld [vmem:[%s176_s6] sm:$0xff]  ;;  %s239_s25 = sshll.u32 %s235_s20, 4  ;;  %s224_s26 = scalar_lea.sflag [#allocation4], %s170_s7  ;;  %s240_s25 = int_to_ptr.hbm [resolvable:$true] %s239_s25 }
  0x1f   : > { %181 = vperm.xlu0 %407, %v177_v1   ;;  %205 = vmatpush.msra.mxu0 %v198_v5  ;;  %s452_s27 = sshra.s32 %s240_s25, 4  ;;  %s458_s30 = scalar_lea.hbm %s644_s2, 16  ;;  %s453_s27 = int_to_ptr.hbm [resolvable:$true] %s452_s27 }
  0x20   : > { %s454_s28 = scalar_lea.hbm %s453_s27, 8  ;;  %p459_p5 = scmp.lt.s32.totalorder %s453_s27, %s644_s2 }
  0x21   : > { %206 = vmatpush.msra.mxu0 %v197_v6  ;;  %p455_p1 = scmp.ne.s32.totalorder %s453_s27, %s454_s28  ;;  %p460_p6 = scmp.lt.s32.totalorder %s458_s30, %s454_s28 }
  0x23   : > { %207 = vmatpush.msra.mxu0 %v196_v7  ;;  %p456_p2 = pnand %p455_p1, %p582_p4  ;;  %p461_p7 = por %p460_p6, %p459_p5 }
  0x25   : > { %208 = vmatpush.msra.mxu0 %v195_v8  ;;  %p457_p3 = pneg %p456_p2 }
  0x27   : > { %209 = vmatpush.msra.mxu0 %v194_v9  ;;  %p462_p9 = pnand %p461_p7, %p457_p3 }
  0x29   : > { %210 = vmatpush.msra.mxu0 %v193_v10 }
  0x2b   : > { %211 = vmatpush.msra.mxu0 %v192_v11 }
  0x2d   : > { %212 = vmatpush.msra.mxu0 %v191_v12 }
  0x2f   : > { %213 = vmatpush.msra.mxu0 %v190_v13 }
  0x31   : > { %214 = vmatpush.msra.mxu0 %v189_v14 }
  0x33   : > { %215 = vmatpush.msra.mxu0 %v188_v15 }
  0x35   : > { %216 = vmatpush.msra.mxu0 %v187_v16 }
  0x37   : > { %217 = vmatpush.msra.mxu0 %v186_v17 }
  0x91   : > { %v182_v20 = vpop.permute.xlu0 %181 }
  0x92   : > { %vm183_vm0 = vcmp.eq.s32.totalorder %v182_v20, %v179_v19 }
  0x93   : > { %332 = vmatmul.msk.f32.vlgmr.msra.gmra.mxu0 %vm183_vm0, %v526_v21 }
 0x110   : > { %v219_v22 = vpop.f32.mrf.mxu0 }
 0x111   : > { %222 = vst [vmem:[%s172_s23] sm:$0xff] %v219_v22 }
 0x112   : > { %465 = shalt.err (!%p462_p9)
}
 0x113   : > { %341 = dma.vmem_to_hbm [thread:$0]  (%p582_p4), %s238_s24, 128, %s240_s25, %s224_s26  }
 0x114 PF: > { %p353_p10 = scmp.ge.s32.totalorder %s520_s14, 2  ;;  %s251_s5 = sand.u32 1, %s500_s9  }
 0x115   : > { %s252_s6 = scalar_lea.sflag [#allocation4], %s251_s5 }
 0x116   : > { %p348_p11 = pnand %p353_p10, %p589_p8 }
 0x118   : > { %p349_p12 = pneg %p348_p11 }
 0x11a   : > { %495 = dma.done.wait (%p349_p12), %s252_s6, 128  }
 0x11b   : > { %497 = vsyncadd (%p349_p12), %s252_s6, 4294967168  ;;  %s16_s14 = sadd.s32 1, %s520_s14   ;;  %s647_s9 = smov %s504_s10 }
 0x11c   : > { %p13_p13 = scmp.ge.s32.totalorder %s16_s14, 4   ;;  %s648_s10 = smov %s508_s11 }
 0x11d   : > { %s649_s11 = smov %s595_s22  ;;  %s650_s12 = smov %s516_s13 }
 0x11e   : > { %s651_s13 = smov %s653_s17  ;;  %15 = sbr.rel (!%p13_p13) target bundleno = 5 (0x5), region = 69 }
 0x123   :  { %258 = vsyncpa [#allocation3], 1 }
 0x124   :  { %260 = vsyncpa [#allocation3 + $0x1], 1 }
 0x125   :  { %261 = vsyncpa [#allocation4], 1 }
 0x126   :  { %263 = vsyncpa [#allocation4 + $0x1], 1 }

</bundles_post_ra>
